<compile_context>
chip_gen: v7x
topology: tpu7x:2x2x1
jax: 0.10.0
libtpu: 0.0.40
codegen_flags: <defaults>
</compile_context>

<pallas_src>
import jax
import jax.numpy as jnp
from jax.experimental import pallas as pl
from jax.experimental.pallas import tpu as pltpu


def _round_up(n, m):
    return ((n + m - 1) // m) * m


def _default_compute_dtype():
    """bf16 on v6e / v7x (bf16 VPU+EUP); f32 on v5e and everything else."""
    try:
        kind = jax.devices()[0].device_kind.lower()
    except Exception:
        return jnp.float32
    if "tpu" not in kind and not kind.startswith("v"):
        return jnp.float32
    if ("v6" in kind) or ("v7" in kind):
        return jnp.bfloat16
    return jnp.float32


def _critic_kernel(x_ref, w1_ref, b1_ref, w2_ref, b2_ref, w3_ref, b3_ref, o_ref):
    # x_ref: (3, TILE_B) f32.  Weights are PyTorch (out, in) layout, pre-cast
    # to the compute dtype; b1 is (64, 1) in the compute dtype; b2/b3 are f32.
    act_dtype = w1_ref.dtype

    x = x_ref[...].astype(act_dtype)                        # (3, TILE_B)
    w1 = w1_ref[...]                                        # (64, 3)

    # Layer 1: K=3 contraction as three VPU broadcast multiply-adds, computed
    # directly in the compute dtype (no f32 detour, no tiny-K MXU matmul).
    pre1 = (w1[:, 0:1] * x[0:1, :]
            + w1[:, 1:2] * x[1:2, :]
            + w1[:, 2:3] * x[2:3, :]
            + b1_ref[...])                                  # (64, TILE_B) act
    h1 = jnp.tanh(pre1)                                     # EUP tanh (packed bf16 on v6e/v7x)

    # Layer 2: (32, 64) @ (64, TILE_B) on the MXU, f32 accumulation + f32 bias.
    pre2 = jnp.dot(w2_ref[...], h1,
                   preferred_element_type=jnp.float32) + b2_ref[...]
    h2 = jnp.tanh(pre2.astype(act_dtype))                   # (32, TILE_B)

    # Head: (1, 32) @ (32, TILE_B); lane-dense f32 output block.
    o_ref[...] = (jnp.dot(w3_ref[...], h2,
                          preferred_element_type=jnp.float32)
                  + b3_ref[...]).astype(o_ref.dtype)        # (1, TILE_B)


def _choose_tile(batch, tile_b):
    """Multiple of 128, capped for v7x VMEM, shrunk so big batches keep >=~4 steps."""
    tile_b = _round_up(max(128, int(tile_b)), 128)
    tile_b = min(tile_b, 16384)                             # VMEM headroom on v7x (64 MiB/TC)
    quarter = _round_up(pl.cdiv(batch, 4), 128)             # aim for >= ~4 grid steps
    return max(128, min(tile_b, quarter))


def critic_forward_lane_major(xt, kernel_params, *, tile_b=8192):
    """xt: (3, B) float32 -> (1, B) float32.  Zero wrapper-side HBM round trips.

    kernel_params come from pack_params_for_kernel.
    """
    w1, b1, w2, b2, w3, b3 = kernel_params
    B = xt.shape[1]

    tile_b = _choose_tile(B, tile_b)
    grid = (pl.cdiv(B, tile_b),)                            # last block may overhang (column-local ops)

    const = lambda i: (0, 0)
    param_bytes = sum(int(p.size) * p.dtype.itemsize for p in kernel_params)
    act_bytes = jnp.dtype(w1.dtype).itemsize
    # Include the f32 I/O tiles (double-buffered), params, and the in-body
    # temporaries actually materialized (x cast, pre1/h1, pre2/h2, f32 epilogue).
    vmem_needed = (2 * (3 + 1) * tile_b * 4
                   + 2 * param_bytes
                   + (3 + 64 + 64 + 32 + 32) * tile_b * act_bytes
                   + (32 + 1) * tile_b * 4)
    vmem_limit = int(min(max(2 * vmem_needed, 32 << 20), 48 << 20))

    cost = pl.CostEstimate(
        flops=2 * B * (3 * 64 + 64 * 32 + 32 * 1),
        transcendentals=B * (64 + 32),
        bytes_accessed=B * (3 + 1) * 4 + param_bytes,
    )

    return pl.pallas_call(
        _critic_kernel,
        out_shape=jax.ShapeDtypeStruct((1, B), jnp.float32),
        grid=grid,
        in_specs=[
            pl.BlockSpec((3, tile_b), lambda i: (0, i)),    # x tile (batch on lanes)
            pl.BlockSpec((64, 3), const),                   # w1
            pl.BlockSpec((64, 1), const),                   # b1
            pl.BlockSpec((32, 64), const),                  # w2
            pl.BlockSpec((32, 1), const),                   # b2
            pl.BlockSpec((1, 32), const),                   # w3
            pl.BlockSpec((1, 1), const),                    # b3
        ],
        out_specs=pl.BlockSpec((1, tile_b), lambda i: (0, i)),
        compiler_params=pltpu.CompilerParams(
            dimension_semantics=("parallel",),              # 2-TC sharding on v7x only
            vmem_limit_bytes=vmem_limit,
        ),
        cost_estimate=cost,
    )(xt, w1, b1, w2, b2, w3, b3)


def critic_forward(x, kernel_params, *, tile_b=8192):
    """PyTorch-compatible interface: x (B, 3) float32 -> state_value (B, 1) float32.

    Note: the two transposes here are XLA ops outside the kernel; prefer
    critic_forward_lane_major when the caller can keep the (3, B) layout.
    """
    out = critic_forward_lane_major(x.T, kernel_params, tile_b=tile_b)
    return out.T                                            # (B, 1)


def init_critic_params(key):
    """PyTorch nn.Linear default init: U(-1/sqrt(fan_in), 1/sqrt(fan_in)), weight (out, in)."""
    def linear(key, fan_in, fan_out):
        kw, kb = jax.random.split(key)
        bound = 1.0 / jnp.sqrt(fan_in)
        w = jax.random.uniform(kw, (fan_out, fan_in), jnp.float32, -bound, bound)
        b = jax.random.uniform(kb, (fan_out,), jnp.float32, -bound, bound)
        return w, b

    k1, k2, k3 = jax.random.split(key, 3)
    w1, b1 = linear(k1, 3, 64)    # affine1
    w2, b2 = linear(k2, 64, 32)   # affine2
    w3, b3 = linear(k3, 32, 1)    # critic_head
    return (w1, b1, w2, b2, w3, b3)


def pack_params_for_kernel(params, compute_dtype=None):
    """One-time packing: weights stay (out, in) and are pre-cast to the compute
    dtype (so no per-grid-step casts); b1 -> (out, 1) in the compute dtype;
    b2/b3 -> (out, 1) f32 for accurate MXU epilogues."""
    if compute_dtype is None:
        compute_dtype = _default_compute_dtype()
    w1, b1, w2, b2, w3, b3 = params
    return (w1.astype(compute_dtype),
            b1.reshape(-1, 1).astype(compute_dtype),
            w2.astype(compute_dtype),
            b2.reshape(-1, 1).astype(jnp.float32),
            w3.astype(compute_dtype),
            b3.reshape(-1, 1).astype(jnp.float32))


def critic_reference(x, params):
    w1, b1, w2, b2, w3, b3 = params
    h1 = jnp.tanh(x @ w1.T + b1)
    h2 = jnp.tanh(h1 @ w2.T + b2)
    return h2 @ w3.T + b3


if __name__ == "__main__":
    key = jax.random.PRNGKey(0)
    k_params, k_x1, k_x2 = jax.random.split(key, 3)

    params = init_critic_params(k_params)

    # f32 path: bit-accurate against the reference on every TPU generation.
    kparams_f32 = pack_params_for_kernel(params, compute_dtype=jnp.float32)
    # Default path: bf16 compute on v6e/v7x, f32 elsewhere (auto-selected).
    default_dtype = _default_compute_dtype()
    kparams_auto = pack_params_for_kernel(params)

    # Small batch (single partial lane tile, no padding in the wrapper).
    x_small = jax.random.normal(k_x1, (8, 3), dtype=jnp.float32)
    out_small = jax.block_until_ready(critic_forward(x_small, kparams_f32))
    ref_small = critic_reference(x_small, params)
    assert out_small.shape == (8, 1)
    assert jnp.allclose(out_small, ref_small, atol=1e-5, rtol=1e-5)

    # Multi-tile batch (3 x 128-column tiles) exercising the pipelined grid,
    # using the lane-major entry point (no wrapper transposes on the input side).
    x_big = jax.random.normal(k_x2, (384, 3), dtype=jnp.float32)
    xt_big = x_big.T                                        # caller-side layout choice
    out_big = jax.block_until_ready(
        critic_forward_lane_major(xt_big, kparams_f32, tile_b=128))
    ref_big = critic_reference(x_big, params)
    assert out_big.shape == (1, 384)
    assert jnp.allclose(out_big.T, ref_big, atol=1e-5, rtol=1e-5)

    # Auto-selected compute dtype (bf16 fast path on v6e/v7x, f32 on v5e).
    tol = 3e-2 if default_dtype == jnp.bfloat16 else 1e-5
    out_auto = jax.block_until_ready(critic_forward(x_big, kparams_auto))
    assert out_auto.shape == (384, 1)
    assert jnp.allclose(out_auto, ref_big, atol=tol, rtol=tol)

    print("KERNEL_OK")
</pallas_src>

<mosaic_0001>
module attributes {stable_mosaic.version = 11 : i64} {
  func.func @_critic_kernel(%arg0: i32, %arg1: memref<3x128xf32, #tpu.memory_space<vmem>>, %arg2: memref<64x3xf32, #tpu.memory_space<vmem>>, %arg3: memref<64x1xf32, #tpu.memory_space<vmem>>, %arg4: memref<32x64xf32, #tpu.memory_space<vmem>>, %arg5: memref<32x1xf32, #tpu.memory_space<vmem>>, %arg6: memref<1x32xf32, #tpu.memory_space<vmem>>, %arg7: memref<1x1xf32, #tpu.memory_space<vmem>>, %arg8: memref<1x128xf32, #tpu.memory_space<vmem>>) attributes {dimension_semantics = [#tpu.dimension_semantics<parallel>], iteration_bounds = array<i64: 1>, scalar_prefetch = 0 : i64, scratch_operands = 0 : i64, tpu.core_type = #tpu.core_type<tc>, window_params = [{transform_indices = @transform_0, window_bounds = array<i64: 3, 128>}, {pipeline_mode = #tpu.pipeline_mode<synchronous>, transform_indices = @transform_1, window_bounds = array<i64: 64, 3>}, {pipeline_mode = #tpu.pipeline_mode<synchronous>, transform_indices = @transform_2, window_bounds = array<i64: 64, 1>}, {pipeline_mode = #tpu.pipeline_mode<synchronous>, transform_indices = @transform_3, window_bounds = array<i64: 32, 64>}, {pipeline_mode = #tpu.pipeline_mode<synchronous>, transform_indices = @transform_4, window_bounds = array<i64: 32, 1>}, {pipeline_mode = #tpu.pipeline_mode<synchronous>, transform_indices = @transform_5, window_bounds = array<i64: 1, 32>}, {pipeline_mode = #tpu.pipeline_mode<synchronous>, transform_indices = @transform_6, window_bounds = array<i64: 1, 1>}, {transform_indices = @transform_7, window_bounds = array<i64: 1, 128>}]} {
    %c0 = arith.constant 0 : index
    %c0_0 = arith.constant 0 : index
    %0 = vector.load %arg1[%c0, %c0_0] : memref<3x128xf32, #tpu.memory_space<vmem>>, vector<3x128xf32>
    %c0_1 = arith.constant 0 : index
    %c0_2 = arith.constant 0 : index
    %1 = vector.load %arg2[%c0_1, %c0_2] : memref<64x3xf32, #tpu.memory_space<vmem>>, vector<64x3xf32>
    %2 = vector.extract_strided_slice %1 {offsets = [0, 0], sizes = [64, 1], strides = [1, 1]} : vector<64x3xf32> to vector<64x1xf32>
    %3 = vector.extract_strided_slice %0 {offsets = [0, 0], sizes = [1, 128], strides = [1, 1]} : vector<3x128xf32> to vector<1x128xf32>
    %4 = vector.broadcast %2 : vector<64x1xf32> to vector<64x128xf32>
    %5 = vector.broadcast %3 : vector<1x128xf32> to vector<64x128xf32>
    %6 = arith.mulf %4, %5 : vector<64x128xf32>
    %7 = vector.extract_strided_slice %1 {offsets = [0, 1], sizes = [64, 1], strides = [1, 1]} : vector<64x3xf32> to vector<64x1xf32>
    %8 = vector.extract_strided_slice %0 {offsets = [1, 0], sizes = [1, 128], strides = [1, 1]} : vector<3x128xf32> to vector<1x128xf32>
    %9 = vector.broadcast %7 : vector<64x1xf32> to vector<64x128xf32>
    %10 = vector.broadcast %8 : vector<1x128xf32> to vector<64x128xf32>
    %11 = arith.mulf %9, %10 : vector<64x128xf32>
    %12 = arith.addf %6, %11 : vector<64x128xf32>
    %13 = vector.extract_strided_slice %1 {offsets = [0, 2], sizes = [64, 1], strides = [1, 1]} : vector<64x3xf32> to vector<64x1xf32>
    %14 = vector.extract_strided_slice %0 {offsets = [2, 0], sizes = [1, 128], strides = [1, 1]} : vector<3x128xf32> to vector<1x128xf32>
    %15 = vector.broadcast %13 : vector<64x1xf32> to vector<64x128xf32>
    %16 = vector.broadcast %14 : vector<1x128xf32> to vector<64x128xf32>
    %17 = arith.mulf %15, %16 : vector<64x128xf32>
    %18 = arith.addf %12, %17 : vector<64x128xf32>
    %c0_3 = arith.constant 0 : index
    %c0_4 = arith.constant 0 : index
    %19 = vector.load %arg3[%c0_3, %c0_4] : memref<64x1xf32, #tpu.memory_space<vmem>>, vector<64x1xf32>
    %20 = vector.broadcast %19 : vector<64x1xf32> to vector<64x128xf32>
    %21 = arith.addf %18, %20 : vector<64x128xf32>
    %22 = math.tanh %21 : vector<64x128xf32>
    %c0_5 = arith.constant 0 : index
    %c0_6 = arith.constant 0 : index
    %23 = vector.load %arg4[%c0_5, %c0_6] : memref<32x64xf32, #tpu.memory_space<vmem>>, vector<32x64xf32>
    %cst = arith.constant dense<0.000000e+00> : vector<32x128xf32>
    %24 = tpu.matmul %23, %22, %cst {dimension_numbers = #tpu.dot_dimension_numbers<[1], [0], [0], [1], [0, 0, 1, 1], [], []>} : vector<32x64xf32>, vector<64x128xf32>, vector<32x128xf32> -> vector<32x128xf32>
    %c0_7 = arith.constant 0 : index
    %c0_8 = arith.constant 0 : index
    %25 = vector.load %arg5[%c0_7, %c0_8] : memref<32x1xf32, #tpu.memory_space<vmem>>, vector<32x1xf32>
    %26 = vector.broadcast %25 : vector<32x1xf32> to vector<32x128xf32>
    %27 = arith.addf %24, %26 : vector<32x128xf32>
    %28 = math.tanh %27 : vector<32x128xf32>
    %c0_9 = arith.constant 0 : index
    %c0_10 = arith.constant 0 : index
    %29 = vector.load %arg6[%c0_9, %c0_10] : memref<1x32xf32, #tpu.memory_space<vmem>>, vector<1x32xf32>
    %cst_11 = arith.constant dense<0.000000e+00> : vector<1x128xf32>
    %30 = tpu.matmul %29, %28, %cst_11 {dimension_numbers = #tpu.dot_dimension_numbers<[1], [0], [0], [1], [0, 0, 1, 1], [], []>} : vector<1x32xf32>, vector<32x128xf32>, vector<1x128xf32> -> vector<1x128xf32>
    %c0_12 = arith.constant 0 : index
    %c0_13 = arith.constant 0 : index
    %31 = vector.load %arg7[%c0_12, %c0_13] : memref<1x1xf32, #tpu.memory_space<vmem>>, vector<1x1xf32>
    %32 = vector.broadcast %31 : vector<1x1xf32> to vector<1x128xf32>
    %33 = arith.addf %30, %32 : vector<1x128xf32>
    %c0_14 = arith.constant 0 : index
    %c0_15 = arith.constant 0 : index
    %34 = vector.load %arg8[%c0_14, %c0_15] : memref<1x128xf32, #tpu.memory_space<vmem>>, vector<1x128xf32>
    tpu.vector_store %arg8[%c0_14, %c0_15], %33 {strides = array<i32>} : memref<1x128xf32, #tpu.memory_space<vmem>>, vector<1x128xf32>,
    return
  }
  func.func @transform_0(%arg0: i32) -> (i32, i32) {
    %c0_i32 = arith.constant 0 : i32
    %c0_i32_0 = arith.constant 0 : i32
    return %c0_i32, %arg0 : i32, i32
  }
  func.func @transform_1(%arg0: i32) -> (i32, i32) {
    %c0_i32 = arith.constant 0 : i32
    %c0_i32_0 = arith.constant 0 : i32
    %c0_i32_1 = arith.constant 0 : i32
    return %c0_i32, %c0_i32_0 : i32, i32
  }
  func.func @transform_2(%arg0: i32) -> (i32, i32) {
    %c0_i32 = arith.constant 0 : i32
    %c0_i32_0 = arith.constant 0 : i32
    %c0_i32_1 = arith.constant 0 : i32
    return %c0_i32, %c0_i32_0 : i32, i32
  }
  func.func @transform_3(%arg0: i32) -> (i32, i32) {
    %c0_i32 = arith.constant 0 : i32
    %c0_i32_0 = arith.constant 0 : i32
    %c0_i32_1 = arith.constant 0 : i32
    return %c0_i32, %c0_i32_0 : i32, i32
  }
  func.func @transform_4(%arg0: i32) -> (i32, i32) {
    %c0_i32 = arith.constant 0 : i32
    %c0_i32_0 = arith.constant 0 : i32
    %c0_i32_1 = arith.constant 0 : i32
    return %c0_i32, %c0_i32_0 : i32, i32
  }
  func.func @transform_5(%arg0: i32) -> (i32, i32) {
    %c0_i32 = arith.constant 0 : i32
    %c0_i32_0 = arith.constant 0 : i32
    %c0_i32_1 = arith.constant 0 : i32
    return %c0_i32, %c0_i32_0 : i32, i32
  }
  func.func @transform_6(%arg0: i32) -> (i32, i32) {
    %c0_i32 = arith.constant 0 : i32
    %c0_i32_0 = arith.constant 0 : i32
    %c0_i32_1 = arith.constant 0 : i32
    return %c0_i32, %c0_i32_0 : i32, i32
  }
  func.func @transform_7(%arg0: i32) -> (i32, i32) {
    %c0_i32 = arith.constant 0 : i32
    %c0_i32_0 = arith.constant 0 : i32
    return %c0_i32, %arg0 : i32, i32
  }
}

</mosaic_0001>

<bundles_post_ra>
// kernel: tpu_custom_call.1
= control target key start
LH: loop header
LB: loop body
LE: loop exit
PB: predicated region body
PF: predicated region fallthrough
CT: control target
= control target key end

     0   :  { %s824_s0 = inlined_call_operand.vmem [shape: f32[3,8], index: 0, kind: input, shape index: {}]   ;;  %s825_s1 = inlined_call_operand.vmem [shape: f32[64,3], index: 1, kind: input, shape index: {}]   ;;  %s826_s2 = inlined_call_operand.vmem [shape: f32[64,1], index: 2, kind: input, shape index: {}]   ;;  %s827_s3 = inlined_call_operand.vmem [shape: f32[32,64], index: 3, kind: input, shape index: {}]   ;;  %s828_s4 = inlined_call_operand.vmem [shape: f32[32,1], index: 4, kind: input, shape index: {}]   ;;  %s829_s5 = inlined_call_operand.vmem [shape: f32[1,32], index: 5, kind: input, shape index: {}]   ;;  %s830_s6 = inlined_call_operand.<no memory space> [shape: f32[1,1], index: 6, kind: input, shape index: {}]   ;;  %s831_s7 = inlined_call_operand.hbm [shape: f32[1,8], index: 7, kind: output, shape index: {}]  }
   0x1   :  { %v12_v0 = vstv %s830_s6 }
   0x2   :  { %13 = vst [vmem:[#allocation2] sm:$0x1] %v12_v0 }
   0x3   :  { %v30_v1 = vld [vmem:[%s825_s1] sm:$0xff]  ;;  %v635_v2 = vmov 2   ;;  %v636_v3 = vmov 1   ;;  %v32_v4 = vld [vmem:[%s825_s1 + $0x10] sm:$0xff]  ;;  %v31_v5 = vld [vmem:[%s825_s1 + $0x8] sm:$0xff] }
   0x4   :  { %573 = vset.pattern.permute.xlu0 %v635_v2  ;;  %572 = vset.pattern.permute.xlu1 %v636_v3  ;;  %v35_v6 = vld [vmem:[%s825_s1 + $0x28] sm:$0xff] }
   0x5   :  { %143 = vperm.xlu0 %573, %v30_v1   ;;  %91 = vperm.xlu1 %572, %v30_v1  }
   0x9   :  { %151 = vperm.xlu0 %573, %v32_v4   ;;  %95 = vperm.xlu1 %572, %v31_v5  }
   0xa   :  { %14 = vsyncpa [#allocation4], 0  ;;  %v34_v7 = vld [vmem:[%s825_s1 + $0x20] sm:$0xff]  ;;  %v637_v8 = vmov 0   ;;  %v37_v9 = vld [vmem:[%s825_s1 + $0x38] sm:$0xff]  ;;  %vm286_vm0 = vcmask 523264   ;;  %v78_v32 = vlaneseq }
   0xb   :  { %v33_v10 = vld [vmem:[%s825_s1 + $0x18] sm:$0xff]  ;;  %v194_v11 = vld [vmem:[%s826_s2] sm:$0xff]  ;;  %v195_v12 = vld [vmem:[%s826_s2 + $0x8] sm:$0xff]  ;;  %vm639_vm1 = vmmov 0   ;;  %vm399_vm2 = vcmask 261120   ;;  %s641_s25 = smov [#allocation3]  }
   0xc   :  { %v36_v13 = vld [vmem:[%s825_s1 + $0x30] sm:$0xff]  ;;  %v198_v14 = vld [vmem:[%s826_s2 + $0x20] sm:$0xff]  ;;  %v201_v15 = vld [vmem:[%s826_s2 + $0x38] sm:$0xff]  ;;  %v751_v34 = vshrl.u32 %v78_v32, 7  ;;  %s480_s26 = sshll.u32 %s641_s25, 4  ;;  %s481_s26 = int_to_ptr.vmem [resolvable:$true] %s480_s26 }
   0xd   :  { %163 = vperm.xlu0 %573, %v35_v6   ;;  %574 = vset.pattern.permute.xlu1 %v635_v2  ;;  %v263_v16 = vld [vmem:[%s828_s4 + $0x8] sm:$0xff]  ;;  %v265_v17 = vld [vmem:[%s828_s4 + $0x18] sm:$0xff]  ;;  %v196_v18 = vld [vmem:[%s826_s2 + $0x10] sm:$0xff]  ;;  %s611_s27 = scalar_lea.vmem %s481_s26, 16  ;;  %s615_s1 = scalar_lea.vmem %s481_s26, 32 }
   0xe   :  { %147 = vperm.xlu1 %574, %v31_v5   ;;  %v197_v19 = vld [vmem:[%s826_s2 + $0x18] sm:$0xff]  ;;  %v199_v20 = vld [vmem:[%s826_s2 + $0x28] sm:$0xff]  ;;  %v200_v21 = vld [vmem:[%s826_s2 + $0x30] sm:$0xff]  ;;  %v124_v37 = vsub.s32 1, %v751_v34  ;;  %v80_v38 = vsub.s32 0, %v751_v34  ;;  %v176_v42 = vsub.s32 2, %v751_v34  ;;  %p612_p0 = scmp.ne.s32.totalorder %s481_s26, %s611_s27  ;;  %p616_p1 = scmp.lt.s32.totalorder %s481_s26, %s481_s26 }
   0xf   :  { %v262_v22 = vld [vmem:[%s828_s4] sm:$0xff]  ;;  %v264_v23 = vld [vmem:[%s828_s4 + $0x10] sm:$0xff]  ;;  %p617_p2 = scmp.lt.s32.totalorder %s615_s1, %s611_s27 }
  0x10   :  { %v389_v24 = vld [vmem:[#allocation2] sm:$0x1] }
  0x11   :  { %581 = vset.pattern.permute.xlu0 %v636_v3  ;;  %v258_v25 = vld [vmem:[%s827_s3] sm:$0xff]  ;;  %p618_p3 = por %p617_p2, %p616_p1 }
  0x12   :  { %107 = vperm.xlu0 %581, %v34_v7   ;;  %575 = vset.pattern.permute.xlu1 %v637_v8  ;;  %v29_v39 = vld [vmem:[%s824_s0] sm:$0x7] }
  0x13   :  { %50 = vperm.xlu1 %575, %v32_v4   ;;  %526 = vmatprep.mubr.msk.f32.mxu0 %vm286_vm0, %v258_v25  ;;  %v760_v41 = vrot.slane %v29_v39, %v124_v37  ;;  %v765_v43 = vrot.slane %v29_v39, %v80_v38  ;;  %v769_v48 = vrot.slane %v29_v39, %v176_v42  ;;  %p619_p4 = pnand %p618_p3, %p612_p0 }
  0x16   :  { %119 = vperm.xlu0 %581, %v37_v9  }
  0x17   :  { %576 = vset.pattern.permute.xlu1 %v636_v3 }
  0x18   :  { %99 = vperm.xlu1 %576, %v32_v4  }
  0x1a   :  { %584 = vset.pattern.permute.xlu0 %v637_v8 }
  0x1b   :  { %40 = vperm.xlu0 %584, %v30_v1  }
  0x1c   :  { %103 = vperm.xlu1 %576, %v33_v10  }
  0x1f   :  { %45 = vperm.xlu0 %584, %v31_v5  }
  0x20   :  { %577 = vset.pattern.permute.xlu1 %v635_v2 }
  0x21   :  { %155 = vperm.xlu1 %577, %v33_v10  }
  0x23   :  { %55 = vperm.xlu0 %584, %v33_v10  }
  0x25   :  { %578 = vset.pattern.permute.xlu1 %v637_v8 }
  0x26   :  { %204 = vperm.xlu1 %578, %v194_v11  }
  0x27   :  { %209 = vperm.xlu0 %584, %v195_v12  }
  0x2a   :  { %60 = vperm.xlu1 %578, %v34_v7  }
  0x2b   :  { %70 = vperm.xlu0 %584, %v36_v13  }
  0x2e   :  { %65 = vperm.xlu1 %578, %v35_v6  }
  0x2f   :  { %224 = vperm.xlu0 %584, %v198_v14  }
  0x32   :  { %579 = vset.pattern.permute.xlu1 %v636_v3 }
  0x33   :  { %111 = vperm.xlu1 %579, %v35_v6   ;;  %239 = vperm.xlu0 %584, %v201_v15  }
  0x37   :  { %580 = vset.pattern.permute.xlu1 %v635_v2  ;;  %273 = vperm.xlu0 %584, %v263_v16  }
  0x38   :  { %159 = vperm.xlu1 %580, %v34_v7  }
  0x3b   :  { %283 = vperm.xlu0 %584, %v265_v17  }
  0x3c   :  { %582 = vset.pattern.permute.xlu1 %v637_v8 }
  0x3d   :  { %214 = vperm.xlu1 %582, %v196_v18  }
  0x41   :  { %219 = vperm.xlu1 %582, %v197_v19  }
  0x45   :  { %75 = vperm.xlu1 %582, %v37_v9  }
  0x49   :  { %583 = vset.pattern.permute.xlu1 %v636_v3 }
  0x4a   :  { %115 = vperm.xlu1 %583, %v36_v13  }
  0x4e   :  { %585 = vset.pattern.permute.xlu1 %v635_v2 }
  0x4f   :  { %167 = vperm.xlu1 %585, %v36_v13  }
  0x53   :  { %171 = vperm.xlu1 %585, %v37_v9  }
  0x57   :  { %586 = vset.pattern.permute.xlu1 %v637_v8 }
  0x58   :  { %229 = vperm.xlu1 %586, %v199_v20  }
  0x5c   :  { %234 = vperm.xlu1 %586, %v200_v21  }
  0x60   :  { %268 = vperm.xlu1 %586, %v262_v22  }
  0x64   :  { %278 = vperm.xlu1 %586, %v264_v23  }
  0x68   :  { %392 = vperm.xlu1 %586, %v389_v24  }
  0x84   :  { %v92_v26 = vpop.permute.xlu1 %91  ;;  %v144_v27 = vpop.permute.xlu0 %143 }
  0x85   :  { %v126_v47 = vmul.f32 %v760_v41, %v92_v26  ;;  %v178_v52 = vmul.f32 %v769_v48, %v144_v27 }
  0x88   :  { %v96_v28 = vpop.permute.xlu1 %95  ;;  %v152_v29 = vpop.permute.xlu0 %151 }
  0x89   :  { %v127_v50 = vmul.f32 %v760_v41, %v96_v28  ;;  %v180_v10 = vmul.f32 %v769_v48, %v152_v29 }
  0x8c   :  { %v749_v30 = vpop.permute.xlu0 %163 }
  0x8d   :  { %v148_v31 = vpop.permute.xlu1 %147 }
  0x8e   :  { %v179_v57 = vmul.f32 %v769_v48, %v148_v31 }
  0x91   :  { %v108_v33 = vpop.permute.xlu0 %107 }
  0x92   :  { %v51_v35 = vpop.permute.xlu1 %50  ;;  %v130_v23 = vmul.f32 %v760_v41, %v108_v33 }
  0x93   :  { %v84_v7 = vmul.f32 %v765_v43, %v51_v35 }
  0x95   :  { %v753_v36 = vpop.permute.xlu0 %119 }
  0x96   :  { %v133_v33 = vmul.f32 %v760_v41, %v753_v36 }
  0x97   :  { %v100_v40 = vpop.permute.xlu1 %99 }
  0x98   :  { %v128_v5 = vmul.f32 %v760_v41, %v100_v40 }
  0x9a   :  { %v41_v44 = vpop.permute.xlu0 %40  ;;  %v136_v11 = vadd.f32 %v128_v5, %v84_v7  ;;  %v640_v5 = vmov 0.0  }
  0x9b   :  { %v104_v45 = vpop.permute.xlu1 %103  ;;  %v82_v46 = vmul.f32 %v765_v43, %v41_v44  ;;  %540 = vmatprep.mubr.msk.f32.mxu1 %vm639_vm1, %v640_v5 }
  0x9c   :  { %v129_v12 = vmul.f32 %v760_v41, %v104_v45  ;;  %v188_v15 = vadd.f32 %v180_v10, %v136_v11 }
  0x9d   :  { %v134_v53 = vadd.f32 %v126_v47, %v82_v46 }
  0x9e   :  { %v46_v49 = vpop.permute.xlu0 %45 }
  0x9f   :  { %v83_v51 = vmul.f32 %v765_v43, %v46_v49  ;;  %v186_v58 = vadd.f32 %v178_v52, %v134_v53  ;;  %v183_v49 = vmul.f32 %v769_v48, %v749_v30 }
  0xa0   :  { %v156_v54 = vpop.permute.xlu1 %155 }
  0xa1   :  { %v135_v55 = vadd.f32 %v127_v50, %v83_v51  ;;  %v181_v16 = vmul.f32 %v769_v48, %v156_v54 }
  0xa2   :  { %v56_v56 = vpop.permute.xlu0 %55 }
  0xa3   :  { %v187_v60 = vadd.f32 %v179_v57, %v135_v55  ;;  %v85_v8 = vmul.f32 %v765_v43, %v56_v56 }
  0xa5   :  { %v205_v59 = vpop.permute.xlu1 %204  ;;  %v137_v13 = vadd.f32 %v129_v12, %v85_v8 }
  0xa6   :  { %v242_v61 = vadd.f32 %v205_v59, %v186_v58  ;;  %v210_v62 = vpop.permute.xlu0 %209 }
  0xa7   :  { %v243_v63 = vadd.f32 %v210_v62, %v187_v60  ;;  %v189_v18 = vadd.f32 %v181_v16, %v137_v13 }
  0xa8   :  { %587 = vtanh.f32 %v242_v61 }
  0xa9   :  { %589 = vtanh.f32 %v243_v63  ;;  %v61_v0 = vpop.permute.xlu1 %60 }
  0xaa   :  { %v86_v24 = vmul.f32 %v765_v43, %v61_v0  ;;  %v71_v26 = vpop.permute.xlu0 %70 }
  0xab   :  { %v88_v53 = vmul.f32 %v765_v43, %v71_v26 }
  0xac   :  { %v138_v35 = vadd.f32 %v130_v23, %v86_v24  ;;  %v388_v24 = vld [vmem:[%s829_s5] sm:$0x1] }
  0xad   :  { %v66_v1 = vpop.permute.xlu1 %65 }
  0xae   :  { %v87_v39 = vmul.f32 %v765_v43, %v66_v1  ;;  %v225_v44 = vpop.permute.xlu0 %224  ;;  %v259_v1 = vld [vmem:[%s827_s3 + $0x8] sm:$0xff] }
  0xb2   :  { %v588_v2 = vpop.eup %587  ;;  %v112_v3 = vpop.permute.xlu1 %111 }
  0xb3   :  { %v590_v4 = vpop.eup %589  ;;  %v131_v29 = vmul.f32 %v760_v41, %v112_v3  ;;  %v240_v56 = vpop.permute.xlu0 %239  ;;  %v261_v3 = vld [vmem:[%s827_s3 + $0x18] sm:$0xff] }
  0xb4   :  { %v543_v6 = vpack.c.bf16 %v590_v4, %v588_v2  ;;  %v260_v2 = vld [vmem:[%s827_s3 + $0x10] sm:$0xff]  ;;  %v638_v4 = vmov 0.0|0.0  }
  0xb5   :  { %v139_v42 = vadd.f32 %v131_v29, %v87_v39  ;;  %559 = vmatprep.subr.bf16.mxu1 %v638_v4 }
  0xb6   :  { %544 = vmatprep.subr.bf16.mxu0 %v543_v6 }
  0xb7   :  { %v160_v9 = vpop.permute.xlu1 %159  ;;  %546 = vmatpush3.bf16.msra.mxu0 %v543_v6  ;;  %v191_v36 = vadd.f32 %v183_v49, %v139_v42  ;;  %v274_v6 = vpop.permute.xlu0 %273 }
  0xb8   :  { %v182_v28 = vmul.f32 %v769_v48, %v160_v9 }
  0xba   :  { %v190_v40 = vadd.f32 %v182_v28, %v138_v35 }
  0xbb   :  { %v284_v12 = vpop.permute.xlu0 %283 }
  0xbc   :  { %v215_v14 = vpop.permute.xlu1 %214  ;;  %v246_v51 = vadd.f32 %v225_v44, %v190_v40 }
  0xbd   :  { %v244_v17 = vadd.f32 %v215_v14, %v188_v15 }
  0xbf   :  { %591 = vtanh.f32 %v244_v17 }
  0xc0   :  { %v220_v19 = vpop.permute.xlu1 %219 }
  0xc1   :  { %v245_v20 = vadd.f32 %v220_v19, %v189_v18 }
  0xc3   :  { %593 = vtanh.f32 %v245_v20 }
  0xc4   :  { %v76_v21 = vpop.permute.xlu1 %75  ;;  %595 = vtanh.f32 %v246_v51 }
  0xc5   :  { %v89_v37 = vmul.f32 %v765_v43, %v76_v21 }
  0xc7   :  { %v141_v46 = vadd.f32 %v133_v33, %v89_v37 }
  0xc9   :  { %v116_v22 = vpop.permute.xlu1 %115  ;;  %v592_v25 = vpop.eup %591 }
  0xca   :  { %v132_v50 = vmul.f32 %v760_v41, %v116_v22 }
  0xcc   :  { %v140_v57 = vadd.f32 %v132_v50, %v88_v53 }
  0xcd   :  { %v594_v27 = vpop.eup %593 }
  0xce   :  { %v168_v31 = vpop.permute.xlu1 %167  ;;  %v547_v32 = vpack.c.bf16 %v594_v27, %v592_v25  ;;  %v596_v30 = vpop.eup %595 }
  0xcf   :  { %v184_v54 = vmul.f32 %v769_v48, %v168_v31 }
  0xd0   :  { %548 = vmatprep.subr.bf16.mxu0 %v547_v32 }
  0xd1   :  { %550 = vmatpush3.bf16.msra.mxu0 %v547_v32  ;;  %v192_v60 = vadd.f32 %v184_v54, %v140_v57 }
  0xd2   :  { %v172_v45 = vpop.permute.xlu1 %171 }
  0xd3   :  { %v185_v47 = vmul.f32 %v769_v48, %v172_v45 }
  0xd5   :  { %v193_v52 = vadd.f32 %v185_v47, %v141_v46 }
  0xd7   :  { %v230_v55 = vpop.permute.xlu1 %229  ;;  %v249_v59 = vadd.f32 %v240_v56, %v193_v52 }
  0xd8   :  { %v247_v58 = vadd.f32 %v230_v55, %v191_v36 }
  0xda   :  { %597 = vtanh.f32 %v247_v58 }
  0xdb   :  { %v235_v61 = vpop.permute.xlu1 %234  ;;  %599 = vtanh.f32 %v249_v59 }
  0xdc   :  { %v248_v62 = vadd.f32 %v235_v61, %v192_v60 }
  0xde   :  { %601 = vtanh.f32 %v248_v62 }
  0xdf   :  { %v269_v7 = vpop.permute.xlu1 %268 }
  0xe3   :  { %v279_v14 = vpop.permute.xlu1 %278 }
  0xe4   :  { %v598_v41 = vpop.eup %597 }
  0xe5   :  { %v551_v63 = vpack.c.bf16 %v598_v41, %v596_v30  ;;  %v600_v0 = vpop.eup %599 }
  0xe7   :  { %552 = vmatprep.subr.bf16.mxu0 %v551_v63  ;;  %v393_v25 = vpop.permute.xlu1 %392 }
  0xe8   :  { %v602_v43 = vpop.eup %601  ;;  %554 = vmatpush3.bf16.msra.mxu0 %v551_v63  ;;  %v398_v26 = vrot.slane %v393_v25, %v80_v38 }
  0xe9   :  { %v555_v48 = vpack.c.bf16 %v600_v0, %v602_v43 }
  0xeb   :  { %556 = vmatprep.subr.bf16.mxu0 %v555_v48 }
  0xec   :  { %558 = vmatpush3.bf16.msra.mxu0 %v555_v48 }
  0xef   :  { %527 = vmatmul.mubr.msk.f32.vlgmr.msra.gmra.mrb[0].mxu0 %vm286_vm0, %v259_v1 }
  0xf0   :  { %529 = vmatprep.mubr.msk.f32.mxu0 %vm286_vm0, %v260_v2 }
  0xf3   :  { %530 = vmatmul.mubr.msk.f32.gmra.mrb[2].mxu0 %vm286_vm0, %v261_v3 }
 0x1c2   :  { %v528_v8 = vpop.f32.mrb[0].mxu0 }
 0x1c3   :  { %v371_v9 = vadd.f32 %v528_v8, %v274_v6  ;;  %v365_v10 = vpop.f32.mrb[1].mxu0 }
 0x1c4   :  { %v366_v11 = vadd.f32 %v365_v10, %v269_v7 }
 0x1c5   :  { %603 = vtanh.f32 %v371_v9 }
 0x1c6   :  { %605 = vtanh.f32 %v366_v11  ;;  %v531_v13 = vpop.f32.mrb[2].mxu0 }
 0x1c7   :  { %v381_v15 = vadd.f32 %v531_v13, %v284_v12  ;;  %v375_v16 = vpop.f32.mrb[3].mxu0 }
 0x1c8   :  { %v376_v17 = vadd.f32 %v375_v16, %v279_v14 }
 0x1c9   :  { %607 = vtanh.f32 %v381_v15 }
 0x1ca   :  { %609 = vtanh.f32 %v376_v17 }
 0x1cf   :  { %v604_v18 = vpop.eup %603 }
 0x1d0   :  { %v606_v19 = vpop.eup %605 }
 0x1d1   :  { %v560_v20 = vpack.c.bf16 %v604_v18, %v606_v19 }
 0x1d3   :  { %v608_v21 = vpop.eup %607  ;;  %561 = vmatpush3.bf16.msra.mxu1 %v560_v20 }
 0x1d4   :  { %v610_v22 = vpop.eup %609  ;;  %562 = vmatprep.subr.bf16.mxu1 %v638_v4 }
 0x1d5   :  { %v563_v23 = vpack.c.bf16 %v608_v21, %v610_v22 }
 0x1d7   :  { %564 = vmatpush3.bf16.msra.mxu1 %v563_v23 }
 0x1da   :  { %541 = vmatmul.mubr.msk.f32.vlgmr.msra.gmra.mrb[0].mxu1 %vm399_vm2, %v388_v24 }
 0x2ad   :  { %v469_v27 = vpop.f32.mrb[0].mxu1 }
 0x2ae   :  { %v470_v28 = vadd.f32 %v469_v27, %v398_v26  ;;  %v542_v29 = vpop.f32.mrb[1].mxu1 }
 0x2b0   :  { %473 = vst [vmem:[#allocation3] sm:$0x1] %v470_v28 }
 0x2b1   :  { %622 = shalt.err (!%p619_p4)
}
 0x2b2   :  { %s623_s29 = scalar_lea.hbm %s831_s7, 16 }
 0x2b3   :  { %p624_p5 = scmp.ne.s32.totalorder %s831_s7, %s623_s29  ;;  %p627_p6 = scmp.lt.u32.totalorder %s623_s29, %s831_s7 }
 0x2b5   :  { %p629_p7 = pnand %p627_p6, %p624_p5 }
 0x2b7   :  { %632 = shalt.err (!%p629_p7)
}
 0x2b8   :  { %483 = dma.vmem_to_hbm [thread:$0]  %s481_s26, 16, %s831_s7, [#allocation4]  }
 0x2b9   :  { %633 = dma.done.wait [#allocation4], 16  }
 0x2ba   :  { %634 = vsyncadd [#allocation4], 4294967280 }
 0x2bb   :  { %487 = vsyncpa [#allocation4], 1 }

</bundles_post_ra>
